<compile_context>
chip_gen: v7x
topology: tpu7x:2x2x1
jax: 0.10.0
libtpu: 0.0.40
codegen_flags: <defaults>
</compile_context>

<pallas_src>
import math

import jax
import jax.numpy as jnp
from jax.experimental import pallas as pl
from jax.experimental.pallas import tpu as pltpu

_LANE_CANDIDATES = (1024, 512, 256, 128)   # lane-dense last dims (multiples of 128)
_FALLBACK_LANE = 512                       # used only when total % 128 != 0
_TARGET_TILE_BYTES = 2 * 1024 * 1024       # ~2 MiB/tile -> ~8 MiB double-buffered


def _swish_kernel(beta_ref, x_ref, o_ref):
    # beta_ref: SMEM scalar (shape (1,), f32); x_ref/o_ref: VMEM (tile_r, lane) tiles.
    x = x_ref[...].astype(jnp.float32)          # compute in f32 regardless of dtype
    beta = beta_ref[0]
    z = beta * x
    # sigmoid(z) = 0.5 * (1 + tanh(0.5 * z)): single EUP op, stable for large |z|.
    sig = 0.5 * (jnp.tanh(0.5 * z) + 1.0)
    o_ref[...] = (x * sig).astype(o_ref.dtype)


def swish(x, beta=1.0, *, donate_x=False):
    """Swish forward: x * sigmoid(beta * x). Any shape / rank / float dtype."""
    orig_shape = x.shape
    orig_dtype = x.dtype
    total = math.prod(orig_shape) if orig_shape else 1
    if total == 0:
        return x

    itemsize = jnp.dtype(orig_dtype).itemsize

    # Widest lane count (multiple of 128) that divides the element count ->
    # no pad / slice (each of those is a full extra HBM pass).
    lane = next((l for l in _LANE_CANDIDATES if total % l == 0), None)
    padded = lane is None
    if padded:
        lane = _FALLBACK_LANE                  # ragged total: pad as a last resort

    rows = -(-total // lane)                   # cdiv
    flat = x.reshape(-1)
    if padded:
        # swish(0) == 0, so zero padding is harmless; sliced off below.
        flat = jnp.pad(flat, (0, rows * lane - total))
    x2d = flat.reshape(rows, lane)

    # ~2 MiB tiles, dtype-aware. Pallas handles the ragged last row-block itself.
    tile_r_target = max(32, _TARGET_TILE_BYTES // (lane * itemsize))
    if rows <= tile_r_target:
        tile_r = rows                          # single block: full dim, no 8-row rule
    else:
        tile_r = (tile_r_target // 32) * 32    # multiple of 32: safe for f32/bf16/i8

    grid = (pl.cdiv(rows, tile_r),)
    beta_arr = jnp.asarray([beta], dtype=jnp.float32)

    call_kwargs = {}
    if donate_x and not padded:
        # Reuse the input's HBM buffer for the output (saves a full-size alloc).
        call_kwargs["input_output_aliases"] = {1: 0}

    out2d = pl.pallas_call(
        _swish_kernel,
        out_shape=jax.ShapeDtypeStruct((rows, lane), orig_dtype),
        grid=grid,
        in_specs=[
            pl.BlockSpec(memory_space=pltpu.SMEM),              # beta scalar
            pl.BlockSpec((tile_r, lane), lambda i: (i, 0)),     # input tile
        ],
        out_specs=pl.BlockSpec((tile_r, lane), lambda i: (i, 0)),
        compiler_params=pltpu.CompilerParams(
            dimension_semantics=("parallel",),                  # 2 TCs on v7x
        ),
        **call_kwargs,
    )(beta_arr, x2d)

    out_flat = out2d.reshape(-1)
    if padded:
        out_flat = out_flat[:total]
    return out_flat.reshape(orig_shape)


if __name__ == "__main__":
    key = jax.random.PRNGKey(0)
    beta = 1.0  # module default: trainable_beta=False, initial_beta=1.0

    def ref_swish(x, b):
        x32 = x.astype(jnp.float32)
        return (x32 * jax.nn.sigmoid(b * x32)).astype(x.dtype)

    # 1) Small NCHW input consistent with a conv-net activation (no-pad path).
    x = jax.random.normal(key, (2, 4, 16, 16), dtype=jnp.float32)
    out = swish(x, beta)
    jax.block_until_ready(out)
    assert out.shape == x.shape and out.dtype == x.dtype
    assert jnp.allclose(out, ref_swish(x, beta), atol=1e-5, rtol=1e-5)

    # 2) Larger input exercising a multi-tile grid with a ragged last row-block
    #    (819200 elems -> rows=800 at lane=1024, tile_r=512 -> 2 grid steps).
    x2 = jax.random.normal(jax.random.PRNGKey(0), (4, 8, 128, 200), dtype=jnp.float32)
    out2 = swish(x2, beta)
    jax.block_until_ready(out2)
    assert out2.shape == x2.shape and out2.dtype == x2.dtype
    assert jnp.allclose(out2, ref_swish(x2, beta), atol=1e-5, rtol=1e-5)

    # 3) Ragged element count (105 elems) -> pad fallback path.
    x3 = jax.random.normal(jax.random.PRNGKey(0), (3, 5, 7), dtype=jnp.float32)
    out3 = swish(x3, beta)
    jax.block_until_ready(out3)
    assert out3.shape == x3.shape and out3.dtype == x3.dtype
    assert jnp.allclose(out3, ref_swish(x3, beta), atol=1e-5, rtol=1e-5)

    # 4) bf16 input: kernel upcasts to f32 internally, casts back at the store.
    x4 = jax.random.normal(jax.random.PRNGKey(0), (2, 4, 16, 16), dtype=jnp.bfloat16)
    out4 = swish(x4, beta)
    jax.block_until_ready(out4)
    assert out4.shape == x4.shape and out4.dtype == x4.dtype
    assert jnp.allclose(out4.astype(jnp.float32),
                        ref_swish(x4, beta).astype(jnp.float32),
                        atol=1e-2, rtol=1e-2)

    print("KERNEL_OK")
</pallas_src>

<mosaic_0001>
module attributes {stable_mosaic.version = 11 : i64} {
  func.func @_swish_kernel(%arg0: i32, %arg1: memref<1xf32, #tpu.memory_space<smem>>, %arg2: memref<2x1024xf32, #tpu.memory_space<vmem>>, %arg3: memref<2x1024xf32, #tpu.memory_space<vmem>>) attributes {dimension_semantics = [#tpu.dimension_semantics<parallel>], iteration_bounds = array<i64: 1>, scalar_prefetch = 0 : i64, scratch_operands = 0 : i64, tpu.core_type = #tpu.core_type<tc>, window_params = [{transform_indices = @transform_0, window_bounds = array<i64: 1>}, {transform_indices = @transform_1, window_bounds = array<i64: 2, 1024>}, {transform_indices = @transform_2, window_bounds = array<i64: 2, 1024>}]} {
    %c0 = arith.constant 0 : index
    %c0_0 = arith.constant 0 : index
    %0 = vector.load %arg2[%c0, %c0_0] : memref<2x1024xf32, #tpu.memory_space<vmem>>, vector<2x1024xf32>
    %c0_1 = arith.constant 0 : index
    %1 = memref.load %arg1[%c0_1] : memref<1xf32, #tpu.memory_space<smem>>
    %2 = vector.broadcast %1 : f32 to vector<2x1024xf32>
    %3 = arith.mulf %2, %0 : vector<2x1024xf32>
    %cst = arith.constant 5.000000e-01 : f32
    %4 = vector.broadcast %cst : f32 to vector<2x1024xf32>
    %5 = arith.mulf %4, %3 : vector<2x1024xf32>
    %6 = math.tanh %5 : vector<2x1024xf32>
    %cst_2 = arith.constant 1.000000e+00 : f32
    %7 = vector.broadcast %cst_2 : f32 to vector<2x1024xf32>
    %8 = arith.addf %6, %7 : vector<2x1024xf32>
    %cst_3 = arith.constant 5.000000e-01 : f32
    %9 = vector.broadcast %cst_3 : f32 to vector<2x1024xf32>
    %10 = arith.mulf %9, %8 : vector<2x1024xf32>
    %11 = arith.mulf %0, %10 : vector<2x1024xf32>
    %c0_4 = arith.constant 0 : index
    %c0_5 = arith.constant 0 : index
    %12 = vector.load %arg3[%c0_4, %c0_5] : memref<2x1024xf32, #tpu.memory_space<vmem>>, vector<2x1024xf32>
    tpu.vector_store %arg3[%c0_4, %c0_5], %11 {strides = array<i32>} : memref<2x1024xf32, #tpu.memory_space<vmem>>, vector<2x1024xf32>,
    return
  }
  func.func @transform_0(%arg0: i32) -> i32 {
    %c0_i32 = arith.constant 0 : i32
    %c0_i32_0 = arith.constant 0 : i32
    return %c0_i32 : i32
  }
  func.func @transform_1(%arg0: i32) -> (i32, i32) {
    %c0_i32 = arith.constant 0 : i32
    %c0_i32_0 = arith.constant 0 : i32
    return %arg0, %c0_i32 : i32, i32
  }
  func.func @transform_2(%arg0: i32) -> (i32, i32) {
    %c0_i32 = arith.constant 0 : i32
    %c0_i32_0 = arith.constant 0 : i32
    return %arg0, %c0_i32 : i32, i32
  }
}

</mosaic_0001>

<bundles_post_ra>
// kernel: tpu_custom_call.1
= control target key start
LH: loop header
LB: loop body
LE: loop exit
PB: predicated region body
PF: predicated region fallthrough
CT: control target
= control target key end

     0   :  { %8 = vsyncpa [#allocation4], 0  ;;  %s156_s0 = inlined_call_operand.<no memory space> [shape: f32[1], index: 0, kind: input, shape index: {}]   ;;  %s157_s1 = inlined_call_operand.hbm [shape: f32[2,1024], index: 1, kind: input, shape index: {}]   ;;  %s158_s2 = inlined_call_operand.hbm [shape: f32[2,1024], index: 2, kind: output, shape index: {}]  }
   0x1   :  { %9 = vsyncpa [#allocation5], 0  ;;  %s112_s9 = smov [#allocation3]   ;;  %s64_s13 = scalar_lea.hbm %s157_s1, 256 }
   0x2   :  { %s18_s10 = sshll.u32 %s112_s9, 4  ;;  %p65_p0 = scmp.ne.s32.totalorder %s157_s1, %s64_s13  ;;  %s19_s10 = int_to_ptr.vmem [resolvable:$true] %s18_s10 }
   0x3   :  { %p68_p1 = scmp.lt.u32.totalorder %s64_s13, %s157_s1 }
   0x5   :  { %p70_p2 = pnand %p68_p1, %p65_p0 }
   0x7   :  { %73 = shalt.err (!%p70_p2)
}
   0x8   :  { %s74_s18 = scalar_lea.vmem %s19_s10, 256  ;;  %p79_p4 = scmp.lt.s32.totalorder %s19_s10, %s19_s10 }
   0x9   :  { %p75_p3 = scmp.ne.s32.totalorder %s19_s10, %s74_s18  ;;  %p80_p5 = scmp.lt.s32.totalorder %s74_s18, %s74_s18 }
   0xb   :  { %p81_p6 = por %p80_p5, %p79_p4 }
   0xd   :  { %p82_p7 = pnand %p81_p6, %p75_p3 }
   0xf   :  { %85 = shalt.err (!%p82_p7)
}
  0x10   :  { %21 = dma.hbm_to_vmem [thread:$0]  %s157_s1, 256, %s19_s10, [#allocation4]  }
  0x11   :  { %108 = dma.done.wait [#allocation4], 256  }
  0x12   :  { %109 = vsyncadd [#allocation4], 4294967040  ;;  %v28_v0 = vstv %s156_s0  ;;  %v25_v1 = vld [vmem:[#allocation3] sm:$0xff]  ;;  %v26_v2 = vld [vmem:[#allocation3 + $0x8] sm:$0xff]  ;;  %s113_s1 = smov [#allocation6]  }
  0x13   :  { %v29_v3 = vmul.f32 %v28_v0, %v25_v1  ;;  %v30_v4 = vmul.f32 %v28_v0, %v26_v2  ;;  %s49_s23 = sshll.u32 %s113_s1, 4  ;;  %s50_s23 = int_to_ptr.vmem [resolvable:$true] %s49_s23 }
  0x14   :  { %s86_s0 = scalar_lea.vmem %s50_s23, 256  ;;  %p91_p9 = scmp.lt.s32.totalorder %s50_s23, %s50_s23 }
  0x15   :  { %v31_v5 = vmul.f32 0.5, %v29_v3  ;;  %v32_v6 = vmul.f32 0.5, %v30_v4  ;;  %p87_p8 = scmp.ne.s32.totalorder %s50_s23, %s86_s0  ;;  %p92_p10 = scmp.lt.s32.totalorder %s86_s0, %s86_s0 }
  0x17   :  { %60 = vtanh.f32 %v31_v5  ;;  %p93_p11 = por %p92_p10, %p91_p9 }
  0x18   :  { %62 = vtanh.f32 %v32_v6 }
  0x19   :  { %p94_p12 = pnand %p93_p11, %p87_p8 }
  0x21   :  { %v61_v7 = vpop.eup %60 }
  0x22   :  { %v63_v8 = vpop.eup %62  ;;  %v35_v9 = vadd.f32 1.0, %v61_v7 }
  0x23   :  { %v36_v10 = vadd.f32 1.0, %v63_v8 }
  0x24   :  { %v37_v11 = vmul.f32 0.5, %v35_v9 }
  0x25   :  { %v38_v12 = vmul.f32 0.5, %v36_v10 }
  0x26   :  { %v39_v13 = vmul.f32 %v37_v11, %v25_v1 }
  0x27   :  { %v40_v14 = vmul.f32 %v38_v12, %v26_v2 }
  0x28   :  { %41 = vst [vmem:[#allocation6] sm:$0xff] %v39_v13 }
  0x29   :  { %42 = vst [vmem:[#allocation6 + $0x8] sm:$0xff] %v40_v14 }
  0x2a   :  { %97 = shalt.err (!%p94_p12)
}
  0x2b   :  { %s98_s26 = scalar_lea.hbm %s158_s2, 256 }
  0x2c   :  { %p99_p13 = scmp.ne.s32.totalorder %s158_s2, %s98_s26  ;;  %p102_p0 = scmp.lt.u32.totalorder %s98_s26, %s158_s2 }
  0x2e   :  { %p104_p1 = pnand %p102_p0, %p99_p13 }
  0x30   :  { %107 = shalt.err (!%p104_p1)
}
  0x31   :  { %52 = dma.vmem_to_hbm [thread:$0]  %s50_s23, 256, %s158_s2, [#allocation5]  }
  0x32   :  { %110 = dma.done.wait [#allocation5], 256  }
  0x33   :  { %111 = vsyncadd [#allocation5], 4294967040 }
  0x34   :  { %56 = vsyncpa [#allocation4], 1 }
  0x35   :  { %57 = vsyncpa [#allocation5], 1 }

</bundles_post_ra>
